<compile_context>
chip_gen: v7x
topology: tpu7x:2x2x1
jax: 0.10.0
libtpu: 0.0.40
codegen_flags: <defaults>
</compile_context>

<pallas_src>
import functools

import jax
import jax.numpy as jnp
from jax.experimental import pallas as pl
from jax.experimental.pallas import tpu as pltpu

FILTER_ORDER = 6
LANES = 128

_FILTER_PATTERNS = {
    "smooth":      [1.0, -0.5,  0.1,    -0.02, 0.004,  -0.0008, 0.00015],
    "butterworth": [1.0, -0.6,  0.2,    -0.05, 0.01,   -0.002,  0.0003],
    "gaussian":    [1.0, -0.7,  0.15,   -0.03, 0.005,  -0.0007, 8e-05],
    "golden_036":  [1.0, -0.36, 0.1296, -0.22, 0.1564, -0.088,  0.0548],
}
_FILTER_NAMES = ["golden_036", "smooth", "butterworth", "gaussian"]


def _get_filter_coefficients(name, order):
    c = list(_FILTER_PATTERNS[name])
    if len(c) > order + 1:
        c = c[: order + 1]
    elif len(c) < order + 1:
        c = c + [0.0] * (order + 1 - len(c))
    return c


def make_filter_bank(filter_order=FILTER_ORDER):
    """(4, filter_order+1) fixed filter bank, matching the PyTorch buffers."""
    return jnp.asarray(
        [_get_filter_coefficients(n, filter_order) for n in _FILTER_NAMES],
        dtype=jnp.float32,
    )


def _spectral_filter_kernel(coeffs_ref, scale_ref, eig_ref, out_ref, *, n_coeffs):
    """coeffs_ref: SMEM (n_coeffs,), scale_ref: SMEM (1,),
    eig_ref/out_ref: VMEM (block_rows, 128) float32."""
    x = eig_ref[...] * scale_ref[0] - 1.0      # 2*(eig/max) - 1, scale hoisted
    two_x = x + x                              # hoisted 2*x

    # Clenshaw recurrence for sum_k c_k T_k(x), statically unrolled.
    #   b_k = c_k + 2x*b_{k+1} - b_{k+2};   result = c_0 + x*b_1 - b_2
    b2 = coeffs_ref[n_coeffs - 1]              # scalar (broadcasts)
    b1 = coeffs_ref[n_coeffs - 2] + two_x * b2  # first vector term
    for k in range(n_coeffs - 3, 0, -1):
        b1, b2 = coeffs_ref[k] + two_x * b1 - b2, b1
    result = coeffs_ref[0] + x * b1 - b2

    # exp(-clamp(|result|, max=10)) + 1e-6
    out_ref[...] = jnp.exp(-jnp.minimum(jnp.abs(result), 10.0)) + 1e-6


def spectral_basis_filter(eigenvalues, mixing_weights, refinement_coeffs,
                          refinement_scale, filter_bank, *, block_rows=512):
    """Forward pass of SpectralBasisFilter (eigenvalues: any shape, float32)."""
    # --- coefficient mixing (a handful of scalars, plain JAX glue) ---
    weights = jax.nn.softmax(mixing_weights)
    mixed_coeffs = jnp.sum(weights[:, None] * filter_bank, axis=0)
    final_coeffs = (mixed_coeffs
                    + refinement_scale * refinement_coeffs).astype(jnp.float32)
    n_coeffs = final_coeffs.shape[0]
    assert n_coeffs >= 3, "kernel assumes filter_order >= 2"

    # --- global max hoisted out of the kernel (correct under tiling) ---
    max_eig = jnp.max(eigenvalues.astype(jnp.float32)) + 1e-8
    scale = jnp.reshape(2.0 / max_eig, (1,)).astype(jnp.float32)

    # --- sublane/lane dense layout + row tiling ---
    orig_shape = eigenvalues.shape
    flat = eigenvalues.reshape(-1).astype(jnp.float32)
    n = flat.shape[0]
    rows = -(-n // LANES)                                  # ceil(n / 128)
    block_rows = -(-block_rows // 8) * 8                   # multiple of 8
    br = max(8, min(block_rows, -(-rows // 8) * 8))        # block rows (mult 8)
    padded_rows = -(-rows // br) * br
    padded_n = padded_rows * LANES
    if padded_n != n:
        flat = jnp.pad(flat, (0, padded_n - n))            # zero pad; sliced off
    eig2d = flat.reshape(padded_rows, LANES)

    kernel = functools.partial(_spectral_filter_kernel, n_coeffs=n_coeffs)
    out = pl.pallas_call(
        kernel,
        out_shape=jax.ShapeDtypeStruct((padded_rows, LANES), jnp.float32),
        grid_spec=pltpu.PrefetchScalarGridSpec(
            num_scalar_prefetch=0,
            grid=(padded_rows // br,),
            in_specs=[
                pl.BlockSpec(memory_space=pltpu.MemorySpace.SMEM),  # coefficients
                pl.BlockSpec(memory_space=pltpu.MemorySpace.SMEM),  # scale
                pl.BlockSpec((br, LANES), lambda i: (i, 0)),        # eigenvalues
            ],
            out_specs=pl.BlockSpec((br, LANES), lambda i: (i, 0)),
        ),
        compiler_params=pltpu.CompilerParams(
            dimension_semantics=("parallel",),
            vmem_limit_bytes=32 * 1024 * 1024,
        ),
    )(final_coeffs, scale, eig2d)

    return out.reshape(-1)[:n].reshape(orig_shape)


def _reference(eigenvalues, mixing_weights, refinement_coeffs,
               refinement_scale, filter_bank):
    """Pure-JAX reference mirroring the PyTorch forward."""
    weights = jax.nn.softmax(mixing_weights)
    final_coeffs = (jnp.sum(weights[:, None] * filter_bank, axis=0)
                    + refinement_scale * refinement_coeffs)
    max_eig = jnp.max(eigenvalues) + 1e-8
    x = 2.0 * (eigenvalues / max_eig) - 1.0
    result = final_coeffs[0] * jnp.ones_like(x)
    t_prev, t_curr = jnp.ones_like(x), x
    result = result + final_coeffs[1] * t_curr
    for i in range(2, final_coeffs.shape[0]):
        t_next = 2.0 * x * t_curr - t_prev
        result = result + final_coeffs[i] * t_next
        t_prev, t_curr = t_curr, t_next
    return jnp.exp(-jnp.minimum(jnp.abs(result), 10.0)) + 1e-6


if __name__ == "__main__":
    key = jax.random.PRNGKey(0)

    # Eigenvalues: small 1-D vector of non-negative values (graph-Laplacian style).
    N = 256
    eigenvalues = jax.random.uniform(key, (N,), dtype=jnp.float32,
                                     minval=0.0, maxval=2.0)

    # Parameters exactly as in SpectralBasisFilter.__init__ (deterministic,
    # init_filter_name='smooth' -> index 1 of the filter bank gets 0.4).
    filter_bank = make_filter_bank(FILTER_ORDER)
    mixing_weights = jnp.full((len(_FILTER_NAMES),), 0.25, dtype=jnp.float32)
    mixing_weights = mixing_weights.at[_FILTER_NAMES.index("smooth")].set(0.4)
    refinement_coeffs = jnp.zeros((FILTER_ORDER + 1,), dtype=jnp.float32)
    refinement_scale = jnp.float32(0.1)

    out = spectral_basis_filter(eigenvalues, mixing_weights, refinement_coeffs,
                                refinement_scale, filter_bank)
    out = jax.block_until_ready(out)

    ref = _reference(eigenvalues, mixing_weights, refinement_coeffs,
                     refinement_scale, filter_bank)
    assert out.shape == eigenvalues.shape
    assert jnp.allclose(out, ref, rtol=1e-4, atol=1e-5), "mismatch vs reference"

    print("KERNEL_OK")
</pallas_src>

<mosaic_0001>
module attributes {stable_mosaic.version = 11 : i64} {
  func.func @_spectral_filter_kernel(%arg0: i32, %arg1: memref<7xf32, #tpu.memory_space<smem>>, %arg2: memref<1xf32, #tpu.memory_space<smem>>, %arg3: memref<8x128xf32, #tpu.memory_space<vmem>>, %arg4: memref<8x128xf32, #tpu.memory_space<vmem>>) attributes {dimension_semantics = [#tpu.dimension_semantics<parallel>], iteration_bounds = array<i64: 1>, scalar_prefetch = 0 : i64, scratch_operands = 0 : i64, tpu.core_type = #tpu.core_type<tc>, window_params = [{transform_indices = @transform_0, window_bounds = array<i64: 7>}, {transform_indices = @transform_1, window_bounds = array<i64: 1>}, {transform_indices = @transform_2, window_bounds = array<i64: 8, 128>}, {transform_indices = @transform_3, window_bounds = array<i64: 8, 128>}]} {
    %c0 = arith.constant 0 : index
    %c0_0 = arith.constant 0 : index
    %0 = vector.load %arg3[%c0, %c0_0] : memref<8x128xf32, #tpu.memory_space<vmem>>, vector<8x128xf32>
    %c0_1 = arith.constant 0 : index
    %1 = memref.load %arg2[%c0_1] : memref<1xf32, #tpu.memory_space<smem>>
    %2 = vector.broadcast %1 : f32 to vector<8x128xf32>
    %3 = arith.mulf %0, %2 : vector<8x128xf32>
    %cst = arith.constant 1.000000e+00 : f32
    %4 = vector.broadcast %cst : f32 to vector<8x128xf32>
    %5 = arith.subf %3, %4 : vector<8x128xf32>
    %6 = arith.addf %5, %5 : vector<8x128xf32>
    %c6 = arith.constant 6 : index
    %7 = memref.load %arg1[%c6] : memref<7xf32, #tpu.memory_space<smem>>
    %c5 = arith.constant 5 : index
    %8 = memref.load %arg1[%c5] : memref<7xf32, #tpu.memory_space<smem>>
    %9 = vector.broadcast %7 : f32 to vector<8x128xf32>
    %10 = arith.mulf %6, %9 : vector<8x128xf32>
    %11 = vector.broadcast %8 : f32 to vector<8x128xf32>
    %12 = arith.addf %11, %10 : vector<8x128xf32>
    %c4 = arith.constant 4 : index
    %13 = memref.load %arg1[%c4] : memref<7xf32, #tpu.memory_space<smem>>
    %14 = arith.mulf %6, %12 : vector<8x128xf32>
    %15 = vector.broadcast %13 : f32 to vector<8x128xf32>
    %16 = arith.addf %15, %14 : vector<8x128xf32>
    %17 = vector.broadcast %7 : f32 to vector<8x128xf32>
    %18 = arith.subf %16, %17 : vector<8x128xf32>
    %c3 = arith.constant 3 : index
    %19 = memref.load %arg1[%c3] : memref<7xf32, #tpu.memory_space<smem>>
    %20 = arith.mulf %6, %18 : vector<8x128xf32>
    %21 = vector.broadcast %19 : f32 to vector<8x128xf32>
    %22 = arith.addf %21, %20 : vector<8x128xf32>
    %23 = arith.subf %22, %12 : vector<8x128xf32>
    %c2 = arith.constant 2 : index
    %24 = memref.load %arg1[%c2] : memref<7xf32, #tpu.memory_space<smem>>
    %25 = arith.mulf %6, %23 : vector<8x128xf32>
    %26 = vector.broadcast %24 : f32 to vector<8x128xf32>
    %27 = arith.addf %26, %25 : vector<8x128xf32>
    %28 = arith.subf %27, %18 : vector<8x128xf32>
    %c1 = arith.constant 1 : index
    %29 = memref.load %arg1[%c1] : memref<7xf32, #tpu.memory_space<smem>>
    %30 = arith.mulf %6, %28 : vector<8x128xf32>
    %31 = vector.broadcast %29 : f32 to vector<8x128xf32>
    %32 = arith.addf %31, %30 : vector<8x128xf32>
    %33 = arith.subf %32, %23 : vector<8x128xf32>
    %c0_2 = arith.constant 0 : index
    %34 = memref.load %arg1[%c0_2] : memref<7xf32, #tpu.memory_space<smem>>
    %35 = arith.mulf %5, %33 : vector<8x128xf32>
    %36 = vector.broadcast %34 : f32 to vector<8x128xf32>
    %37 = arith.addf %36, %35 : vector<8x128xf32>
    %38 = arith.subf %37, %28 : vector<8x128xf32>
    %39 = math.absf %38 : vector<8x128xf32>
    %cst_3 = arith.constant 1.000000e+01 : f32
    %40 = vector.broadcast %cst_3 : f32 to vector<8x128xf32>
    %41 = arith.minimumf %39, %40 : vector<8x128xf32>
    %cst_4 = arith.constant 0.000000e+00 : f32
    %42 = vector.broadcast %cst_4 : f32 to vector<8x128xf32>
    %43 = arith.subf %42, %41 : vector<8x128xf32>
    %44 = math.exp %43 : vector<8x128xf32>
    %cst_5 = arith.constant 9.99999997E-7 : f32
    %45 = vector.broadcast %cst_5 : f32 to vector<8x128xf32>
    %46 = arith.addf %44, %45 : vector<8x128xf32>
    %c0_6 = arith.constant 0 : index
    %c0_7 = arith.constant 0 : index
    %47 = vector.load %arg4[%c0_6, %c0_7] : memref<8x128xf32, #tpu.memory_space<vmem>>, vector<8x128xf32>
    tpu.vector_store %arg4[%c0_6, %c0_7], %46 {strides = array<i32>} : memref<8x128xf32, #tpu.memory_space<vmem>>, vector<8x128xf32>,
    return
  }
  func.func @transform_0(%arg0: i32) -> i32 {
    %c0_i32 = arith.constant 0 : i32
    %c0_i32_0 = arith.constant 0 : i32
    return %c0_i32 : i32
  }
  func.func @transform_1(%arg0: i32) -> i32 {
    %c0_i32 = arith.constant 0 : i32
    %c0_i32_0 = arith.constant 0 : i32
    return %c0_i32 : i32
  }
  func.func @transform_2(%arg0: i32) -> (i32, i32) {
    %c0_i32 = arith.constant 0 : i32
    %c0_i32_0 = arith.constant 0 : i32
    return %arg0, %c0_i32 : i32, i32
  }
  func.func @transform_3(%arg0: i32) -> (i32, i32) {
    %c0_i32 = arith.constant 0 : i32
    %c0_i32_0 = arith.constant 0 : i32
    return %arg0, %c0_i32 : i32, i32
  }
}

</mosaic_0001>

<bundles_post_ra>
// kernel: tpu_custom_call.1
= control target key start
LH: loop header
LB: loop body
LE: loop exit
PB: predicated region body
PF: predicated region fallthrough
CT: control target
= control target key end

     0   :  { %9 = vsyncpa [#allocation6], 0  ;;  %s228_s0 = inlined_call_operand.vmem [shape: f32[7], index: 0, kind: input, shape index: {}]   ;;  %s229_s1 = inlined_call_operand.<no memory space> [shape: f32[1], index: 1, kind: input, shape index: {}]   ;;  %s230_s2 = inlined_call_operand.hbm [shape: f32[8,128], index: 2, kind: input, shape index: {}]   ;;  %s231_s3 = inlined_call_operand.hbm [shape: f32[8,128], index: 3, kind: output, shape index: {}]  }
   0x1   :  { %10 = vsyncpa [#allocation4], 0 }
   0x2   :  { %11 = vsyncpa [#allocation5], 0  ;;  %s18_s14 = sshll.u32 %s228_s0, 4  ;;  %s19_s14 = int_to_ptr.vmem [resolvable:$true] %s18_s14 }
   0x3   :  { %s113_s15 = scalar_lea.vmem %s19_s14, 16  ;;  %p118_p1 = scmp.lt.s32.totalorder %s19_s14, %s19_s14 }
   0x4   :  { %p114_p0 = scmp.ne.s32.totalorder %s19_s14, %s113_s15  ;;  %p119_p2 = scmp.lt.s32.totalorder %s113_s15, %s113_s15 }
   0x6   :  { %p120_p3 = por %p119_p2, %p118_p1 }
   0x8   :  { %p121_p4 = pnand %p120_p3, %p114_p0 }
   0xa   :  { %124 = shalt.err (!%p121_p4)
}
   0xb   :  { %s175_s16 = smov [#allocation3]   ;;  %s176_s17 = smov [#allocation7]  }
   0xc   :  { %21 = dma.vmem_to_smem %s19_s14, 16, %s175_s16, [#allocation6]  }
   0xd   :  { %s30_s18 = sshll.u32 %s176_s17, 4  ;;  %s125_s21 = scalar_lea.hbm %s230_s2, 128  ;;  %s31_s18 = int_to_ptr.vmem [resolvable:$true] %s30_s18 }
   0xe   :  { %p126_p5 = scmp.ne.s32.totalorder %s230_s2, %s125_s21  ;;  %p129_p6 = scmp.lt.u32.totalorder %s125_s21, %s230_s2 }
  0x10   :  { %p131_p7 = pnand %p129_p6, %p126_p5 }
  0x12   :  { %134 = shalt.err (!%p131_p7)
}
  0x13   :  { %s135_s25 = scalar_lea.vmem %s31_s18, 128  ;;  %p140_p9 = scmp.lt.s32.totalorder %s31_s18, %s31_s18 }
  0x14   :  { %p136_p8 = scmp.ne.s32.totalorder %s31_s18, %s135_s25  ;;  %p141_p10 = scmp.lt.s32.totalorder %s135_s25, %s135_s25 }
  0x16   :  { %p142_p11 = por %p141_p10, %p140_p9 }
  0x18   :  { %p143_p12 = pnand %p142_p11, %p136_p8 }
  0x1a   :  { %146 = shalt.err (!%p143_p12)
}
  0x1b   :  { %33 = dma.hbm_to_vmem [thread:$0]  %s230_s2, 128, %s31_s18, [#allocation4]  }
  0x1c   :  { %169 = dma.done.wait [#allocation6], 16  }
  0x1d   :  { %170 = vsyncadd [#allocation6], 4294967280 }
  0x1e   :  { %171 = dma.done.wait [#allocation4], 128  }
  0x1f   :  { %172 = vsyncadd [#allocation4], 4294967168 }
  0x20   :  { %40 = sfence }
  0x21   :  { %v41_v0 = vld [vmem:[#allocation7] sm:$0xff]  ;;  %v43_v1 = vstv %s229_s1  ;;  %s102_s30 = sld [smem:[#allocation3 + $0x6]]  ;;  %s103_s4 = sld [smem:[#allocation3 + $0x5]] }
  0x22   :  { %v44_v2 = vmul.f32 %v43_v1, %v41_v0  ;;  %s104_s5 = sld [smem:[#allocation3 + $0x4]]  ;;  %s105_s2 = sld [smem:[#allocation3 + $0x3]] }
  0x23   :  { %s106_s6 = sld [smem:[#allocation3 + $0x2]]  ;;  %s107_s1 = sld [smem:[#allocation3 + $0x1]] }
  0x24   :  { %v101_v3 = vadd.f32 -1.0, %v44_v2  ;;  %s73_s7 = sld [smem:[#allocation3]]  ;;  %s177_s8 = smov [#allocation8]  }
  0x25   :  { %s91_s9 = sshll.u32 %s177_s8, 4  ;;  %s92_s9 = int_to_ptr.vmem [resolvable:$true] %s91_s9 }
  0x26   :  { %v46_v4 = vadd.f32 %v101_v3, %v101_v3  ;;  %s147_s10 = scalar_lea.vmem %s92_s9, 128  ;;  %p152_p0 = scmp.lt.s32.totalorder %s92_s9, %s92_s9 }
  0x27   :  { %v49_v5 = vstv %s102_s30  ;;  %v51_v6 = vstv %s103_s4  ;;  %p148_p13 = scmp.ne.s32.totalorder %s92_s9, %s147_s10  ;;  %p153_p1 = scmp.lt.s32.totalorder %s147_s10, %s147_s10 }
  0x28   :  { %v50_v7 = vmul.f32 %v49_v5, %v46_v4  ;;  %v55_v9 = vstv %s104_s5  ;;  %v60_v13 = vstv %s105_s2 }
  0x29   :  { %v65_v17 = vstv %s106_s6  ;;  %v70_v21 = vstv %s107_s1  ;;  %p154_p2 = por %p153_p1, %p152_p0 }
  0x2a   :  { %v52_v8 = vadd.f32 %v51_v6, %v50_v7  ;;  %v75_v25 = vstv %s73_s7 }
  0x2b   :  { %p155_p3 = pnand %p154_p2, %p148_p13 }
  0x2c   :  { %v54_v10 = vmul.f32 %v52_v8, %v46_v4 }
  0x2e   :  { %v56_v11 = vadd.f32 %v55_v9, %v54_v10 }
  0x30   :  { %v57_v12 = vsub.f32 %v56_v11, %v49_v5 }
  0x32   :  { %v59_v14 = vmul.f32 %v57_v12, %v46_v4 }
  0x34   :  { %v61_v15 = vadd.f32 %v60_v13, %v59_v14 }
  0x36   :  { %v62_v16 = vsub.f32 %v61_v15, %v52_v8 }
  0x38   :  { %v64_v18 = vmul.f32 %v62_v16, %v46_v4 }
  0x3a   :  { %v66_v19 = vadd.f32 %v65_v17, %v64_v18 }
  0x3c   :  { %v67_v20 = vsub.f32 %v66_v19, %v57_v12 }
  0x3e   :  { %v69_v22 = vmul.f32 %v67_v20, %v46_v4 }
  0x40   :  { %v71_v23 = vadd.f32 %v70_v21, %v69_v22 }
  0x42   :  { %v72_v24 = vsub.f32 %v71_v23, %v62_v16 }
  0x44   :  { %v74_v26 = vmul.f32 %v101_v3, %v72_v24 }
  0x46   :  { %v76_v27 = vadd.f32 %v75_v25, %v74_v26 }
  0x48   :  { %v77_v28 = vsub.f32 %v76_v27, %v67_v20 }
  0x4a   :  { %v78_v29 = vand.u32 2147483647, %v77_v28 }
  0x4c   :  { %v79_v30 = vmin.f32 %v78_v29, 10.0 }
  0x4e   :  { %v80_v31 = vsub.f32 0.0, %v79_v30 }
  0x50   :  { %v81_v32 = vmul.f32 1.442695, %v80_v31 }
  0x52   :  { %111 = vpow2.f32 %v81_v32 }
  0x5c   :  { %v112_v33 = vpop.eup %111 }
  0x5d   :  { %v83_v34 = vadd.f32 1e-06, %v112_v33 }
  0x5f   :  { %84 = vst [vmem:[#allocation8] sm:$0xff] %v83_v34 }
  0x60   :  { %158 = shalt.err (!%p155_p3)
}
  0x61   :  { %s159_s13 = scalar_lea.hbm %s231_s3, 128 }
  0x62   :  { %p160_p4 = scmp.ne.s32.totalorder %s231_s3, %s159_s13  ;;  %p163_p5 = scmp.lt.u32.totalorder %s159_s13, %s231_s3 }
  0x64   :  { %p165_p6 = pnand %p163_p5, %p160_p4 }
  0x66   :  { %168 = shalt.err (!%p165_p6)
}
  0x67   :  { %94 = dma.vmem_to_hbm [thread:$0]  %s92_s9, 128, %s231_s3, [#allocation5]  }
  0x68   :  { %173 = dma.done.wait [#allocation5], 128  }
  0x69   :  { %174 = vsyncadd [#allocation5], 4294967168 }
  0x6a   :  { %98 = vsyncpa [#allocation4], 1 }
  0x6b   :  { %99 = vsyncpa [#allocation5], 1 }
  0x6c   :  { %100 = vsyncpa [#allocation6], 1 }

</bundles_post_ra>
